<compile_context>
chip_gen: v7x
topology: tpu7x:2x2x1
jax: 0.10.0
libtpu: 0.0.40
codegen_flags: <defaults>
</compile_context>

<pallas_src>
import functools
import math

import jax
import jax.numpy as jnp
from jax.experimental import pallas as pl
from jax.experimental.pallas import tpu as pltpu

F32 = jnp.float32
BF16 = jnp.bfloat16
NUM_CLASSES = 2
LANE = 128
_VMEM_LIMIT = 48 * 1024 * 1024

# EfficientNet-B3 config (width 1.2 / depth 1.4 already applied, as in torchvision):
# (expand_ratio, kernel, stride, in_ch, out_ch, num_layers)
B3_STAGES = [
    (1, 3, 1, 40, 24, 2),
    (6, 3, 2, 24, 32, 3),
    (6, 5, 2, 32, 48, 3),
    (6, 3, 2, 48, 96, 5),
    (6, 5, 1, 96, 136, 5),
    (6, 5, 2, 136, 232, 6),
    (6, 3, 1, 232, 384, 2),
]
STEM_CH = 40
HEAD_CH = 1536


def cpad(c):
    return ((c + LANE - 1) // LANE) * LANE


# --------------------------------------------------------------------------
# In-kernel activation helpers (EUP reciprocal keeps the divide off the VALU)
# --------------------------------------------------------------------------
def _silu(y):
    return y * pl.reciprocal(1.0 + jnp.exp(-y), approx=True)


def _sigmoid(y):
    return pl.reciprocal(1.0 + jnp.exp(-y), approx=True)


# --------------------------------------------------------------------------
# Fused matmul kernel: act((A [* gate]) @ W * scale + bias [+ residual])
# --------------------------------------------------------------------------
def _mm_kernel(a_ref, b_ref, s_ref, c_ref, *refs, act, has_gate, has_res):
    o_ref = refs[-1]
    a = a_ref[0]                                   # [TS, K] bf16
    if has_gate:
        a = a * refs[0][0]                         # SE gate [1, K] bf16, broadcast over rows
    y = jnp.dot(a, b_ref[...], preferred_element_type=jnp.float32)   # MXU, f32 acc
    y = y * s_ref[...] + c_ref[...]                # folded BN / bias epilogue (f32)
    if has_res:
        r_ref = refs[1] if has_gate else refs[0]
        y = y + r_ref[0].astype(jnp.float32)       # fused residual add
    if act == "silu":
        y = _silu(y)
    elif act == "sigmoid":
        y = _sigmoid(y)
    o_ref[0] = y.astype(o_ref.dtype)


@functools.lru_cache(maxsize=None)
def _mm_call(B, S, K, Np, TS, TN, act, has_gate, has_res, out_dtype):
    kernel = functools.partial(_mm_kernel, act=act, has_gate=has_gate, has_res=has_res)
    in_specs = [
        pl.BlockSpec((1, TS, K), lambda b, s, n: (b, s, 0)),    # activations (stream)
        pl.BlockSpec((K, TN), lambda b, s, n: (0, n)),          # weights
        pl.BlockSpec((1, TN), lambda b, s, n: (0, n)),          # scale
        pl.BlockSpec((1, TN), lambda b, s, n: (0, n)),          # bias
    ]
    if has_gate:
        in_specs.append(pl.BlockSpec((1, 1, K), lambda b, s, n: (b, 0, 0)))
    if has_res:
        in_specs.append(pl.BlockSpec((1, TS, TN), lambda b, s, n: (b, s, n)))
    return jax.jit(pl.pallas_call(
        kernel,
        grid=(B, pl.cdiv(S, TS), Np // TN),
        in_specs=in_specs,
        out_specs=pl.BlockSpec((1, TS, TN), lambda b, s, n: (b, s, n)),
        out_shape=jax.ShapeDtypeStruct((B, S, Np), out_dtype),
        compiler_params=pltpu.CompilerParams(
            dimension_semantics=("parallel", "parallel", "parallel"),
            vmem_limit_bytes=_VMEM_LIMIT),
    ))


def matmul(a, w, scale, bias, act, gate=None, res=None, out_dtype=BF16):
    # a: [B, S, K] bf16, w: [K, Np] bf16 (Np % 128 == 0), scale/bias: [1, Np] f32
    B, S, K = a.shape
    Np = w.shape[1]
    TS = S if S <= 256 else 256
    TN = 256 if (Np % 256 == 0 and Np >= 256) else LANE
    call = _mm_call(B, S, K, Np, TS, TN, act, gate is not None, res is not None, out_dtype)
    args = [a, w, scale, bias]
    if gate is not None:
        args.append(gate.reshape(B, 1, K))
    if res is not None:
        args.append(res)
    return call(*args)


# --------------------------------------------------------------------------
# Depthwise conv kernel: gridded (batch, 128-channel tile) shift-and-accumulate
# over the padded NHWC input; BN + SiLU fused.  Stride handled by subsampling
# the stride-1 output in the wrapper.
# --------------------------------------------------------------------------
def _dw_kernel(x_ref, w_ref, s_ref, b_ref, o_ref, *, k):
    # x_ref: [1, Hp, Wp, TC] bf16, o_ref: [1, Hf, Wf, TC] bf16 (Hf = Hp-k+1)
    Hf, Wf = o_ref.shape[1], o_ref.shape[2]
    acc = jnp.zeros(o_ref.shape, jnp.float32)
    for ki in range(k):
        for kj in range(k):
            tap = x_ref[:, ki:ki + Hf, kj:kj + Wf, :].astype(jnp.float32)
            acc = acc + tap * w_ref[ki * k + kj, :]
    y = acc * s_ref[0] + b_ref[0]
    o_ref[...] = _silu(y).astype(o_ref.dtype)


@functools.lru_cache(maxsize=None)
def _dw_call(Nb, Hp, Wp, C, k):
    TC = LANE
    Hf, Wf = Hp - k + 1, Wp - k + 1
    kernel = functools.partial(_dw_kernel, k=k)
    return jax.jit(pl.pallas_call(
        kernel,
        grid=(Nb, C // TC),
        in_specs=[
            pl.BlockSpec((1, Hp, Wp, TC), lambda b, c: (b, 0, 0, c)),
            pl.BlockSpec((k * k, TC), lambda b, c: (0, c)),
            pl.BlockSpec((1, TC), lambda b, c: (0, c)),
            pl.BlockSpec((1, TC), lambda b, c: (0, c)),
        ],
        out_specs=pl.BlockSpec((1, Hf, Wf, TC), lambda b, c: (b, 0, 0, c)),
        out_shape=jax.ShapeDtypeStruct((Nb, Hf, Wf, C), BF16),
        compiler_params=pltpu.CompilerParams(
            dimension_semantics=("parallel", "parallel"),
            vmem_limit_bytes=_VMEM_LIMIT),
    ))


def depthwise_bn_silu(xp, w, bn, k):
    Nb, Hp, Wp, C = xp.shape
    s, c = bn
    return _dw_call(Nb, Hp, Wp, C, k)(xp, w, s, c)


# --------------------------------------------------------------------------
# Global average pool: gridded reduction over spatial tiles, f32 accumulator
# --------------------------------------------------------------------------
def _pool_kernel(x_ref, o_ref, acc_ref, *, ts, total, need_mask):
    si = pl.program_id(1)

    @pl.when(si == 0)
    def _():
        acc_ref[...] = jnp.zeros_like(acc_ref)

    x = x_ref[0].astype(jnp.float32)               # [TS, C]
    if need_mask:
        row = jax.lax.broadcasted_iota(jnp.int32, x.shape, 0) + si * ts
        x = jnp.where(row < total, x, 0.0)
    acc_ref[...] += jnp.sum(x, axis=0, keepdims=True)

    @pl.when(si == pl.num_programs(1) - 1)
    def _():
        o_ref[0] = (acc_ref[...] * (1.0 / total)).astype(o_ref.dtype)


@functools.lru_cache(maxsize=None)
def _pool_call(B, S, C):
    TS = S if S <= 512 else 512
    kernel = functools.partial(_pool_kernel, ts=TS, total=S, need_mask=(S % TS) != 0)
    return jax.jit(pl.pallas_call(
        kernel,
        grid=(B, pl.cdiv(S, TS)),
        in_specs=[pl.BlockSpec((1, TS, C), lambda b, s: (b, s, 0))],
        out_specs=pl.BlockSpec((1, 1, C), lambda b, s: (b, 0, 0)),
        out_shape=jax.ShapeDtypeStruct((B, 1, C), BF16),
        scratch_shapes=[pltpu.VMEM((1, C), jnp.float32)],
        compiler_params=pltpu.CompilerParams(
            dimension_semantics=("parallel", "arbitrary"),
            vmem_limit_bytes=_VMEM_LIMIT),
    ))


def global_avg_pool(x3):
    B, S, C = x3.shape
    return _pool_call(B, S, C)(x3).reshape(B, C)


# --------------------------------------------------------------------------
# Fused squeeze-and-excitation MLP: fc1 + SiLU + fc2 + sigmoid in one kernel
# --------------------------------------------------------------------------
def _se_kernel(p_ref, w1_ref, b1_ref, w2_ref, b2_ref, o_ref):
    h = jnp.dot(p_ref[...], w1_ref[...], preferred_element_type=jnp.float32) + b1_ref[...]
    h = _silu(h)
    g = jnp.dot(h.astype(w2_ref.dtype), w2_ref[...], preferred_element_type=jnp.float32)
    o_ref[...] = _sigmoid(g + b2_ref[...]).astype(o_ref.dtype)


@functools.lru_cache(maxsize=None)
def _se_call(B, C, SQ):
    vmem = pl.BlockSpec(memory_space=pltpu.MemorySpace.VMEM)
    return jax.jit(pl.pallas_call(
        _se_kernel,
        in_specs=[vmem] * 5,
        out_specs=vmem,
        out_shape=jax.ShapeDtypeStruct((B, C), BF16),
    ))


def se_gate(pooled, blk):
    B, C = pooled.shape
    return _se_call(B, C, blk["sq_p"])(pooled, blk["se_w1"], blk["se_b1"],
                                       blk["se_w2"], blk["se_b2"])


# --------------------------------------------------------------------------
# Glue (im2col for the stem conv) in plain JAX
# --------------------------------------------------------------------------
def extract_patches(x, k, stride, pad):
    N, H, W, C = x.shape
    Ho = (H + 2 * pad - k) // stride + 1
    Wo = (W + 2 * pad - k) // stride + 1
    xp = jnp.pad(x, ((0, 0), (pad, pad), (pad, pad), (0, 0)))
    pats = []
    for ki in range(k):
        for kj in range(k):
            pats.append(xp[:, ki:ki + (Ho - 1) * stride + 1:stride,
                              kj:kj + (Wo - 1) * stride + 1:stride, :])
    return pats, Ho, Wo


def conv_bn_silu(x, w, bn, k, stride):
    # dense conv (im2col in JAX -> tiled Pallas matmul) + folded BN + SiLU
    Nb, H, W, Cin = x.shape
    pad = (k - 1) // 2
    pats, Ho, Wo = extract_patches(x, k, stride, pad)
    p = jnp.stack(pats, axis=3).reshape(Nb, Ho * Wo, k * k * Cin).astype(BF16)
    scale, bias = bn
    y = matmul(p, w, scale, bias, "silu")
    return y.reshape(Nb, Ho, Wo, w.shape[1])


# --------------------------------------------------------------------------
# Deterministic synthetic parameters (channel dims padded to 128 multiples)
# --------------------------------------------------------------------------
def _conv_w(key, k, cin, cout):
    return jax.random.normal(key, (k, k, cin, cout), F32) * (1.0 / math.sqrt(k * k * cin))


def _pad_mat(x, rows, cols):
    return jnp.pad(x, ((0, rows - x.shape[0]), (0, cols - x.shape[1])))


def _bn_params(key, c, cp, eps=1e-5):
    k1, k2, k3, k4 = jax.random.split(key, 4)
    gamma = jax.random.uniform(k1, (c,), F32, 0.5, 1.5)
    beta = jax.random.normal(k2, (c,), F32) * 0.1
    mean = jax.random.normal(k3, (c,), F32) * 0.1
    var = jax.random.uniform(k4, (c,), F32, 0.5, 1.5)
    scale = gamma / jnp.sqrt(var + eps)
    bias = beta - mean * scale
    return (_pad_mat(scale.reshape(1, c), 1, cp),
            _pad_mat(bias.reshape(1, c), 1, cp))


def init_params(key):
    keys = iter(jax.random.split(key, 2048))
    nk = lambda: next(keys)

    params = {}
    stem_p = cpad(STEM_CH)
    params["stem_w"] = _pad_mat(_conv_w(nk(), 3, 3, STEM_CH).reshape(27, STEM_CH),
                                27, stem_p).astype(BF16)
    params["stem_bn"] = _bn_params(nk(), STEM_CH, stem_p)

    blocks = []
    for (exp, k, s, cin, cout, nlayers) in B3_STAGES:
        for i in range(nlayers):
            b_in = cin if i == 0 else cout
            b_s = s if i == 0 else 1
            expanded = b_in * exp
            sq = max(1, b_in // 4)
            cin_p, cout_p = cpad(b_in), cpad(cout)
            cexp_p, sq_p = cpad(expanded), cpad(sq)
            blk = {"exp_ratio": exp, "k": k, "s": b_s, "cin": b_in, "cout": cout,
                   "cin_p": cin_p, "cout_p": cout_p, "cexp_p": cexp_p, "sq_p": sq_p}
            if exp != 1:
                w = _conv_w(nk(), 1, b_in, expanded).reshape(b_in, expanded)
                blk["exp_w"] = _pad_mat(w, cin_p, cexp_p).astype(BF16)
                blk["exp_bn"] = _bn_params(nk(), expanded, cexp_p)
            dw = jax.random.normal(nk(), (k, k, expanded), F32) * (1.0 / math.sqrt(k * k))
            blk["dw_w"] = _pad_mat(dw.reshape(k * k, expanded), k * k, cexp_p)
            blk["dw_bn"] = _bn_params(nk(), expanded, cexp_p)
            w1 = jax.random.normal(nk(), (expanded, sq), F32) * (1.0 / math.sqrt(expanded))
            blk["se_w1"] = _pad_mat(w1, cexp_p, sq_p).astype(BF16)
            blk["se_b1"] = _pad_mat(jax.random.normal(nk(), (1, sq), F32) * 0.01, 1, sq_p)
            w2 = jax.random.normal(nk(), (sq, expanded), F32) * (1.0 / math.sqrt(sq))
            blk["se_w2"] = _pad_mat(w2, sq_p, cexp_p).astype(BF16)
            blk["se_b2"] = _pad_mat(jax.random.normal(nk(), (1, expanded), F32) * 0.01, 1, cexp_p)
            pw = _conv_w(nk(), 1, expanded, cout).reshape(expanded, cout)
            blk["proj_w"] = _pad_mat(pw, cexp_p, cout_p).astype(BF16)
            blk["proj_bn"] = _bn_params(nk(), cout, cout_p)
            blocks.append(blk)
    params["blocks"] = blocks

    last_c = B3_STAGES[-1][4]
    last_p = cpad(last_c)
    hw = _conv_w(nk(), 1, last_c, HEAD_CH).reshape(last_c, HEAD_CH)
    params["head_w"] = _pad_mat(hw, last_p, HEAD_CH).astype(BF16)
    params["head_bn"] = _bn_params(nk(), HEAD_CH, HEAD_CH)
    fc_p = cpad(NUM_CLASSES)
    fw = jax.random.normal(nk(), (HEAD_CH, NUM_CLASSES), F32) * (1.0 / math.sqrt(HEAD_CH))
    params["fc_w"] = _pad_mat(fw, HEAD_CH, fc_p).astype(BF16)
    params["fc_s"] = _pad_mat(jnp.ones((1, NUM_CLASSES), F32), 1, fc_p)
    params["fc_b"] = _pad_mat(jax.random.normal(nk(), (1, NUM_CLASSES), F32) * 0.01, 1, fc_p)
    return params


# --------------------------------------------------------------------------
# Forward pass
# --------------------------------------------------------------------------
def mbconv(x, blk):
    Nb, H, W, _ = x.shape
    cexp_p, cout_p = blk["cexp_p"], blk["cout_p"]
    k, st = blk["k"], blk["s"]
    inp = x

    # 1) expansion 1x1 conv + BN + SiLU
    if blk["exp_ratio"] != 1:
        s, c = blk["exp_bn"]
        x = matmul(x.reshape(Nb, H * W, x.shape[-1]), blk["exp_w"], s, c,
                   "silu").reshape(Nb, H, W, cexp_p)

    # 2) depthwise kxk conv + BN + SiLU (gridded shift-accumulate; stride by subsample)
    pad = (k - 1) // 2
    xp = jnp.pad(x, ((0, 0), (pad, pad), (pad, pad), (0, 0)))
    y = depthwise_bn_silu(xp, blk["dw_w"], blk["dw_bn"], k)
    if st > 1:
        y = y[:, ::st, ::st, :]
    Ho, Wo = y.shape[1], y.shape[2]
    y3 = y.reshape(Nb, Ho * Wo, cexp_p)

    # 3) squeeze-and-excitation: gridded pool + fused fc1/SiLU/fc2/sigmoid
    pooled = global_avg_pool(y3)
    gate = se_gate(pooled, blk)

    # 4+5) projection 1x1 conv + BN with SE gate and residual fused into the matmul
    s, c = blk["proj_bn"]
    has_res = (st == 1 and blk["cin"] == blk["cout"])
    res = inp.reshape(Nb, H * W, cout_p) if has_res else None
    out = matmul(y3, blk["proj_w"], s, c, None, gate=gate, res=res)
    return out.reshape(Nb, Ho, Wo, cout_p)


def forward(params, x_nchw):
    # x_nchw: [N, 3, H, W] (PyTorch layout) -> logits [N, NUM_CLASSES]
    x = jnp.transpose(x_nchw.astype(F32), (0, 2, 3, 1))        # NHWC

    # stem: 3x3 conv stride 2 + BN + SiLU
    x = conv_bn_silu(x, params["stem_w"], params["stem_bn"], k=3, stride=2)

    # MBConv blocks
    for blk in params["blocks"]:
        x = mbconv(x, blk)

    # head: 1x1 conv + BN + SiLU
    Nb, H, W, C = x.shape
    s, c = params["head_bn"]
    y = matmul(x.reshape(Nb, H * W, C), params["head_w"], s, c, "silu")

    # global average pool
    pooled = global_avg_pool(y)                                # [Nb, 1536] bf16

    # classifier: Dropout(0.3) is identity at eval; Linear(1536, NUM_CLASSES)
    logits = matmul(pooled[None], params["fc_w"], params["fc_s"], params["fc_b"],
                    None, out_dtype=F32)
    return logits[0, :, :NUM_CLASSES]


if __name__ == "__main__":
    key = jax.random.PRNGKey(0)
    pkey, xkey = jax.random.split(key)
    params = init_params(pkey)
    x = jax.random.normal(xkey, (2, 3, 16, 16), F32)           # NCHW, like the PyTorch module
    fwd = jax.jit(functools.partial(forward, params))
    out = jax.block_until_ready(fwd(x))
    assert out.shape == (2, NUM_CLASSES) and out.dtype == F32
    print("KERNEL_OK")
</pallas_src>

<mosaic_0001>
module attributes {stable_mosaic.version = 11 : i64} {
  func.func @_mm_kernel(%arg0: i32, %arg1: i32, %arg2: i32, %arg3: memref<1x64x27xbf16, #tpu.memory_space<vmem>>, %arg4: memref<27x128xbf16, #tpu.memory_space<vmem>>, %arg5: memref<1x128xf32, #tpu.memory_space<vmem>>, %arg6: memref<1x128xf32, #tpu.memory_space<vmem>>, %arg7: memref<1x64x128xbf16, #tpu.memory_space<vmem>>) attributes {dimension_semantics = [#tpu.dimension_semantics<parallel>, #tpu.dimension_semantics<parallel>, #tpu.dimension_semantics<parallel>], iteration_bounds = array<i64: 2, 1, 1>, scalar_prefetch = 0 : i64, scratch_operands = 0 : i64, tpu.core_type = #tpu.core_type<tc>, window_params = [{transform_indices = @transform_0, window_bounds = array<i64: 1, 64, 27>}, {transform_indices = @transform_1, window_bounds = array<i64: 27, 128>}, {transform_indices = @transform_2, window_bounds = array<i64: 1, 128>}, {transform_indices = @transform_3, window_bounds = array<i64: 1, 128>}, {transform_indices = @transform_4, window_bounds = array<i64: 1, 64, 128>}]} {
    %c0 = arith.constant 0 : index
    %c0_0 = arith.constant 0 : index
    %c0_1 = arith.constant 0 : index
    %0 = vector.load %arg3[%c0, %c0_0, %c0_1] : memref<1x64x27xbf16, #tpu.memory_space<vmem>>, vector<1x64x27xbf16>
    %1 = vector.shape_cast %0 : vector<1x64x27xbf16> to vector<64x27xbf16>
    %c0_2 = arith.constant 0 : index
    %c0_3 = arith.constant 0 : index
    %2 = vector.load %arg4[%c0_2, %c0_3] : memref<27x128xbf16, #tpu.memory_space<vmem>>, vector<27x128xbf16>
    %cst = arith.constant dense<0.000000e+00> : vector<64x128xf32>
    %3 = tpu.matmul %1, %2, %cst {dimension_numbers = #tpu.dot_dimension_numbers<[1], [0], [0], [1], [0, 0, 1, 1], [], []>} : vector<64x27xbf16>, vector<27x128xbf16>, vector<64x128xf32> -> vector<64x128xf32>
    %c0_4 = arith.constant 0 : index
    %c0_5 = arith.constant 0 : index
    %4 = vector.load %arg5[%c0_4, %c0_5] : memref<1x128xf32, #tpu.memory_space<vmem>>, vector<1x128xf32>
    %5 = vector.broadcast %4 : vector<1x128xf32> to vector<64x128xf32>
    %6 = arith.mulf %3, %5 : vector<64x128xf32>
    %c0_6 = arith.constant 0 : index
    %c0_7 = arith.constant 0 : index
    %7 = vector.load %arg6[%c0_6, %c0_7] : memref<1x128xf32, #tpu.memory_space<vmem>>, vector<1x128xf32>
    %8 = vector.broadcast %7 : vector<1x128xf32> to vector<64x128xf32>
    %9 = arith.addf %6, %8 : vector<64x128xf32>
    %cst_8 = arith.constant 0.000000e+00 : f32
    %10 = vector.broadcast %cst_8 : f32 to vector<64x128xf32>
    %11 = arith.subf %10, %9 : vector<64x128xf32>
    %12 = math.exp %11 : vector<64x128xf32>
    %cst_9 = arith.constant 1.000000e+00 : f32
    %13 = vector.broadcast %cst_9 : f32 to vector<64x128xf32>
    %14 = arith.addf %13, %12 : vector<64x128xf32>
    %15 = tpu.reciprocal %14 {approx = true} : vector<64x128xf32> -> vector<64x128xf32>
    %16 = arith.mulf %9, %15 : vector<64x128xf32>
    %17 = arith.truncf %16 : vector<64x128xf32> to vector<64x128xbf16>
    %c0_10 = arith.constant 0 : index
    %c0_11 = arith.constant 0 : index
    %c0_12 = arith.constant 0 : index
    %18 = vector.load %arg7[%c0_10, %c0_11, %c0_12] : memref<1x64x128xbf16, #tpu.memory_space<vmem>>, vector<1x64x128xbf16>
    %19 = vector.shape_cast %18 : vector<1x64x128xbf16> to vector<64x128xbf16>
    %20 = vector.shape_cast %17 : vector<64x128xbf16> to vector<1x64x128xbf16>
    tpu.vector_store %arg7[%c0_10, %c0_11, %c0_12], %20 {strides = array<i32>} : memref<1x64x128xbf16, #tpu.memory_space<vmem>>, vector<1x64x128xbf16>,
    return
  }
  func.func @transform_0(%arg0: i32, %arg1: i32, %arg2: i32) -> (i32, i32, i32) {
    %c0_i32 = arith.constant 0 : i32
    %c0_i32_0 = arith.constant 0 : i32
    return %arg0, %arg1, %c0_i32 : i32, i32, i32
  }
  func.func @transform_1(%arg0: i32, %arg1: i32, %arg2: i32) -> (i32, i32) {
    %c0_i32 = arith.constant 0 : i32
    %c0_i32_0 = arith.constant 0 : i32
    return %c0_i32, %arg2 : i32, i32
  }
  func.func @transform_2(%arg0: i32, %arg1: i32, %arg2: i32) -> (i32, i32) {
    %c0_i32 = arith.constant 0 : i32
    %c0_i32_0 = arith.constant 0 : i32
    return %c0_i32, %arg2 : i32, i32
  }
  func.func @transform_3(%arg0: i32, %arg1: i32, %arg2: i32) -> (i32, i32) {
    %c0_i32 = arith.constant 0 : i32
    %c0_i32_0 = arith.constant 0 : i32
    return %c0_i32, %arg2 : i32, i32
  }
  func.func @transform_4(%arg0: i32, %arg1: i32, %arg2: i32) -> (i32, i32, i32) {
    %c0_i32 = arith.constant 0 : i32
    return %arg0, %arg1, %arg2 : i32, i32, i32
  }
}

</mosaic_0001>

<bundles_post_ra>
// kernel: tpu_custom_call.1
= control target key start
LH: loop header
LB: loop body
LE: loop exit
PB: predicated region body
PF: predicated region fallthrough
CT: control target
= control target key end

     0   :  { %9 = vsyncpa [#allocation3], 0  ;;  %s1118_s0 = inlined_call_operand.vmem [shape: bf16[2,64,27], index: 0, kind: input, shape index: {}]   ;;  %s1119_s1 = inlined_call_operand.vmem [shape: bf16[27,128], index: 1, kind: input, shape index: {}]   ;;  %s1120_s2 = inlined_call_operand.vmem [shape: f32[1,128], index: 2, kind: input, shape index: {}]   ;;  %s1121_s3 = inlined_call_operand.vmem [shape: f32[1,128], index: 3, kind: input, shape index: {}]   ;;  %s1122_s4 = inlined_call_operand.hbm [shape: bf16[2,64,128], index: 4, kind: output, shape index: {}]  }
   0x1   :  { %11 = vsyncpa [#allocation3 + $0x1], 0  ;;  %s963_s15 = smov 0   ;;  %s965_s16 = smov 0  }
   0x2   :  { %s967_s17 = smov 0   ;;  %s969_s18 = smov 0  }
   0x3   :  { %s971_s19 = smov 0   ;;  %s973_s20 = smov 0  }
   0x4 LB: > { %s667_s21 = sadd.s32 4294967295, %s932_s20   ;;  %s668_s22 = sadd.s32 4294967294, %s932_s20   ;;  %s932_s20 = sphi %s973_s20, %s17_s20   ;;  %s928_s19 = sphi %s971_s19, %s1129_s19   ;;  %s924_s18 = sphi %s969_s18, %s1128_s18   ;;  %s920_s17 = sphi %s967_s17, %s1127_s17   ;;  %s916_s16 = sphi %s965_s16, %s1126_s16   ;;  %s912_s15 = sphi %s963_s15, %s1125_s15  }
   0x5   : > { %s36_s23 = sadd.s32 1, %s928_s19  ;;  %s153_s24 = sadd.s32 1, %s920_s17 }
   0x6   : > { %p38_p0 = scmp.ge.s32.totalorder %s36_s23, 2  ;;  %p163_p1 = scmp.ne.s32.totalorder %s920_s17, %s916_s16 }
   0x7   : > { %p164_p2 = scmp.eq.s32.totalorder %s667_s21, 1  ;;  %p169_p3 = scmp.ne.s32.totalorder %s916_s16, %s912_s15 }
   0x8   : > { %s1131_s23 = smov (%p38_p0, %s36_s23), 0  ;;  %p170_p5 = scmp.eq.s32.totalorder %s668_s22, 1 }
   0x9   : > { %p1003_p4 = por %p164_p2, %p163_p1  ;;  %s146_s26 = ssub.s32 %s928_s19, %s1131_s23 }
   0xa   : > { %p674_p6 = scmp.ge.s32.totalorder %s932_s20, 1  ;;  %p151_p7 = scmp.eq.s32.totalorder %s146_s26, 0 }
   0xb   : > { %p1010_p8 = por %p170_p5, %p169_p3  ;;  %p220_p9 = scmp.lt.s32.totalorder %s932_s20, 3 }
   0xc   : > { %s1016_s28 = scalar_select %p151_p7, %s920_s17, %s153_s24  }
   0xd   : > { %p221_p10 = pnand %p674_p6, %p220_p9 }
   0xe   : > { %v816_v0 = vld [vmem:[%s1119_s1] sm:$0xff] (!%p221_p10)   ;;  %vm338_vm0 = vcmask (!%p221_p10), 1044480   ;;  %v817_v1 = vld [vmem:[%s1119_s1 + $0x8] sm:$0x3f] (!%p221_p10)   ;;  %vm339_vm1 = vcmask (!%p221_p10), 1045504   ;;  %p261_p11 = scmp.lt.s32.totalorder (!%p221_p10), %s924_s18, 1 }
   0xf   : > { %224 = sbr.rel (%p221_p10) target bundleno = 298 (0x12a), region = 36  ;;  %742 = vmatprep.subr.bf16.mxu0 (!%p221_p10), %v816_v0  ;;  %754 = vmatprep.subr.bf16.mxu1 (!%p221_p10), %v816_v0  ;;  %v934_v2 = vmov (!%p221_p10), 65535   ;;  %vm325_vm2 = vcmask (!%p221_p10), 220160   ;;  %v688_v10 = vld [vmem:[%s1120_s2] ss:$0 sm:$0xff] (!%p221_p10)  ;;  %s257_s22 = sand.u32 (!%p221_p10), 1, %s916_s16  }
  0x10   : > { %743 = vmatpush3.bf16.msra.mxu0 (!%p221_p10), %v816_v0  ;;  %756 = vmatpush3.bf16.msra.mxu1 (!%p221_p10), %v816_v0  ;;  %v340_v3 = vsel (!%p221_p10), %vm338_vm0, 4294967295, %v934_v2  ;;  %v689_v12 = vld [vmem:[%s1121_s3] ss:$0 sm:$0xff] (!%p221_p10)  ;;  %s675_s24 = sshll.u32 (!%p221_p10), %s257_s22, 5  ;;  %s712_s26 = sshll.u32 (!%p221_p10), %s924_s18, 9 }
  0x11   : > { %v341_v4 = vsel (!%p221_p10), %vm339_vm1, %v340_v3, 0  ;;  %s259_s29 = scalar_lea.vmem (!%p221_p10), [#allocation2], %s675_s24  ;;  %s935_s9 = smov (!%p221_p10), [#allocation2]  }
  0x12   : > { %v343_v5 = vand.u32 (!%p221_p10), %v817_v1, %v341_v4  ;;  %s545_s30 = sshll.u32 (!%p221_p10), %s259_s29, 4  ;;  %s858_s10 = sshll.u32 (!%p221_p10), %s935_s9, 4  ;;  %s1068_s30 = int_to_ptr.vmem [resolvable:$true] %s545_s30  ;;  %s859_s10 = int_to_ptr.vmem [resolvable:$false] %s858_s10 }
  0x13   : > { %p861_p1 = scmp.lt.s32.totalorder (!%p221_p10), %s1068_s30, %s859_s10 }
  0x14   : > { %744 = vmatprep.subr.bf16.mxu0 (!%p221_p10), %v343_v5  ;;  %755 = vmatprep.subr.bf16.mxu1 (!%p221_p10), %v343_v5 }
  0x15   : > { %745 = vmatpush3.bf16.msra.mxu0 (!%p221_p10), %v343_v5  ;;  %757 = vmatpush3.bf16.msra.mxu1 (!%p221_p10), %v343_v5 }
  0x16   : > { %s262_s7 = scalar_select %p261_p11, %s924_s18, 1 }
  0x17   : > { %s1066_s18 = scalar_lea.hbm %s1122_s4, %s712_s26 }
  0x18   : > { %s703_s8 = sshll.u32 %s262_s7, 5  ;;  %s1072_s7 = scalar_lea.sflag [#allocation3], %s257_s22 }
  0x19   : > { %s268_s11 = scalar_lea.vmem %s1118_s0, %s703_s8  ;;  %s854_s8 = scalar_lea.vmem %s1068_s30, 512 }
  0x1a   : > { %v818_v6 = vld [vmem:[%s268_s11] sm:$0xff]   ;;  %v819_v7 = vld [vmem:[%s268_s11 + $0x10] sm:$0xff]   ;;  %v820_v8 = vld [vmem:[%s268_s11 + $0x8] sm:$0xff]   ;;  %p855_p12 = scmp.ne.s32.totalorder %s1068_s30, %s854_s8 }
  0x1b   : > { %746 = vmatprep.mubr.msk.bf16.mxu0 %vm325_vm2, %v818_v6  ;;  %750 = vmatprep.mubr.msk.bf16.mxu1 %vm325_vm2, %v819_v7  ;;  %v821_v9 = vld [vmem:[%s268_s11 + $0x18] sm:$0xff]   ;;  %s860_s11 = scalar_lea.vmem %s859_s10, 1024 }
  0x1c   : > { %747 = vmatmul.mubr.msk.bf16.vlgmr.msra.gmra.mrb[0].mxu0 %vm325_vm2, %v820_v8  ;;  %751 = vmatmul.mubr.msk.bf16.vlgmr.msra.gmra.mrb[0].mxu1 %vm325_vm2, %v821_v9  ;;  %p856_p13 = pnand %p855_p12, %p1003_p4  ;;  %p862_p2 = scmp.lt.s32.totalorder %s860_s11, %s854_s8 }
  0x1e   : > { %p857_p0 = pneg %p856_p13  ;;  %p863_p3 = por %p862_p2, %p861_p1 }
  0x20   : > { %p864_p5 = pnand %p863_p3, %p857_p0 }
  0xef   : > { %v748_v11 = vpop.f32.mrb[0].mxu0  ;;  %v752_v14 = vpop.f32.mrb[0].mxu1 }
  0xf0   : > { %v419_v13 = vmul.f32 %v748_v11, %v688_v10  ;;  %v379_v15 = vpop.f32.mrb[1].mxu0  ;;  %v423_v16 = vmul.f32 %v752_v14, %v688_v10  ;;  %v395_v18 = vpop.f32.mrb[1].mxu1 }
  0xf1   : > { %v417_v17 = vmul.f32 %v688_v10, %v379_v15  ;;  %v749_v19 = vpop.f32.mrb[2].mxu0  ;;  %v421_v21 = vmul.f32 %v688_v10, %v395_v18  ;;  %v753_v23 = vpop.f32.mrb[2].mxu1 }
  0xf2   : > { %v1035_v20 = vadd.f32 %v689_v12, %v419_v13  ;;  %v420_v22 = vmul.f32 %v749_v19, %v688_v10  ;;  %v382_v24 = vpop.f32.mrb[3].mxu0  ;;  %v1037_v25 = vadd.f32 %v689_v12, %v423_v16  ;;  %v424_v27 = vmul.f32 %v753_v23, %v688_v10  ;;  %v398_v29 = vpop.f32.mrb[3].mxu1 }
  0xf3   : > { %v1039_v26 = vadd.f32 %v689_v12, %v417_v17  ;;  %v418_v28 = vmul.f32 %v688_v10, %v382_v24  ;;  %v1042_v31 = vadd.f32 %v689_v12, %v421_v21  ;;  %v422_v33 = vmul.f32 %v688_v10, %v398_v29 }
  0xf4   : > { %v442_v30 = vsub.f32 0.0, %v1035_v20  ;;  %v435_v32 = vadd.f32 %v689_v12, %v420_v22  ;;  %v446_v34 = vsub.f32 0.0, %v1037_v25  ;;  %v439_v36 = vadd.f32 %v689_v12, %v424_v27 }
  0xf5   : > { %v440_v35 = vsub.f32 0.0, %v1039_v26  ;;  %v1046_v37 = vadd.f32 %v689_v12, %v418_v28  ;;  %v444_v39 = vsub.f32 0.0, %v1042_v31  ;;  %v1049_v41 = vadd.f32 %v689_v12, %v422_v33 }
  0xf6   : > { %v452_v38 = vmul.f32 1.442695, %v442_v30  ;;  %v443_v40 = vsub.f32 0.0, %v435_v32  ;;  %v460_v42 = vmul.f32 1.442695, %v446_v34  ;;  %v447_v44 = vsub.f32 0.0, %v439_v36 }
  0xf7   : > { %v448_v43 = vmul.f32 1.442695, %v440_v35  ;;  %v441_v45 = vsub.f32 0.0, %v1046_v37  ;;  %v456_v46 = vmul.f32 1.442695, %v444_v39  ;;  %v445_v48 = vsub.f32 0.0, %v1049_v41 }
  0xf8   : > { %822 = vpow2.f32 %v452_v38  ;;  %v454_v47 = vmul.f32 1.442695, %v443_v40  ;;  %v462_v49 = vmul.f32 1.442695, %v447_v44 }
  0xf9   : > { %824 = vpow2.f32 %v460_v42  ;;  %v450_v50 = vmul.f32 1.442695, %v441_v45  ;;  %v458_v51 = vmul.f32 1.442695, %v445_v48 }
  0xfa   : > { %826 = vpow2.f32 %v448_v43 }
  0xfb   : > { %828 = vpow2.f32 %v456_v46 }
  0xfc   : > { %830 = vpow2.f32 %v454_v47 }
  0xfd   : > { %832 = vpow2.f32 %v462_v49 }
  0xfe   : > { %834 = vpow2.f32 %v450_v50 }
  0xff   : > { %836 = vpow2.f32 %v458_v51 }
 0x102   : > { %v823_v52 = vpop.eup %822 }
 0x103   : > { %v825_v53 = vpop.eup %824  ;;  %v466_v54 = vadd.f32 1.0, %v823_v52 }
 0x104   : > { %v827_v55 = vpop.eup %826  ;;  %v470_v56 = vadd.f32 1.0, %v825_v53 }
 0x105   : > { %v829_v57 = vpop.eup %828  ;;  %838 = vrcp.f32 %v466_v54  ;;  %v464_v58 = vadd.f32 1.0, %v827_v55 }
 0x106   : > { %v831_v59 = vpop.eup %830  ;;  %840 = vrcp.f32 %v470_v56  ;;  %v468_v60 = vadd.f32 1.0, %v829_v57 }
 0x107   : > { %v833_v61 = vpop.eup %832  ;;  %842 = vrcp.f32 %v464_v58  ;;  %v467_v62 = vadd.f32 1.0, %v831_v59 }
 0x108   : > { %v835_v63 = vpop.eup %834  ;;  %844 = vrcp.f32 %v468_v60  ;;  %v471_v0 = vadd.f32 1.0, %v833_v61 }
 0x109   : > { %v837_v1 = vpop.eup %836  ;;  %846 = vrcp.f32 %v467_v62  ;;  %v465_v2 = vadd.f32 1.0, %v835_v63 }
 0x10a   : > { %848 = vrcp.f32 %v471_v0  ;;  %v469_v3 = vadd.f32 1.0, %v837_v1 }
 0x10b   : > { %850 = vrcp.f32 %v465_v2 }
 0x10c   : > { %852 = vrcp.f32 %v469_v3 }
 0x10f   : > { %v839_v4 = vpop.eup %838 }
 0x110   : > { %v841_v5 = vpop.eup %840  ;;  %v482_v10 = vmul.f32 %v839_v4, %v1035_v20 }
 0x111   : > { %v843_v6 = vpop.eup %842  ;;  %v486_v13 = vmul.f32 %v841_v5, %v1037_v25 }
 0x112   : > { %v845_v7 = vpop.eup %844  ;;  %v480_v16 = vmul.f32 %v843_v6, %v1039_v26 }
 0x113   : > { %v847_v8 = vpop.eup %846  ;;  %v484_v19 = vmul.f32 %v845_v7, %v1042_v31 }
 0x114   : > { %v849_v9 = vpop.eup %848  ;;  %v483_v11 = vmul.f32 %v847_v8, %v435_v32 }
 0x115   : > { %v851_v12 = vpop.eup %850  ;;  %v487_v14 = vmul.f32 %v849_v9, %v439_v36 }
 0x116   : > { %v853_v15 = vpop.eup %852  ;;  %v721_v17 = vpack.c.bf16 %v483_v11, %v482_v10  ;;  %v481_v18 = vmul.f32 %v851_v12, %v1046_v37 }
 0x117   : > { %v731_v21 = vpack.c.bf16 %v487_v14, %v486_v13  ;;  %v485_v20 = vmul.f32 %v853_v15, %v1049_v41 }
 0x118   : > { %733 = vst [vmem:[%s259_s29 + $0x8] sm:$0xff] %v721_v17   ;;  %v716_v22 = vpack.c.bf16 %v481_v18, %v480_v16 }
 0x119   : > { %735 = vst [vmem:[%s259_s29 + $0x18] sm:$0xff] %v731_v21   ;;  %v726_v23 = vpack.c.bf16 %v485_v20, %v484_v19 }
 0x11a   : > { %717 = vst [vmem:[%s259_s29] sm:$0xff] %v716_v22  }
 0x11b   : > { %734 = vst [vmem:[%s259_s29 + $0x10] sm:$0xff] %v726_v23  }
 0x11c   : > { %867 = shalt.err (!%p864_p5)
}
 0x11d   : > { %s868_s12 = scalar_lea.hbm %s1066_s18, 512  ;;  %s872_s21 = scalar_lea.hbm %s1122_s4, 1024 }
 0x11e   : > { %p869_p6 = scmp.ne.s32.totalorder %s1066_s18, %s868_s12  ;;  %p873_p10 = scmp.lt.u32.totalorder %s1066_s18, %s1122_s4 }
 0x11f   : > { %p874_p11 = scmp.lt.u32.totalorder %s872_s21, %s868_s12  ;;  %p876_p13 = scmp.lt.u32.totalorder %s868_s12, %s1066_s18 }
 0x120   : > { %p870_p7 = pnand %p869_p6, %p1003_p4 }
 0x121   : > { %p875_p12 = por %p874_p11, %p873_p10 }
 0x122   : > { %p871_p9 = pneg %p870_p7 }
 0x123   : > { %p877_p0 = por %p876_p13, %p875_p12 }
 0x125   : > { %p878_p1 = pnand %p877_p0, %p871_p9 }
 0x127   : > { %881 = shalt.err (!%p878_p1)
}
 0x128   : > { %s936_s26 = smov 64   ;;  %s937_s29 = smov 4  }
 0x129   : > { %758 = dma.vmem_to_hbm [thread:$0]  (%p1003_p4), %s1068_s30, 512, %s1066_s18, %s1072_s7, %s936_s26, %s936_s26, %s937_s29  }
 0x12a PF: > { %p764_p2 = scmp.ge.s32.totalorder %s932_s20, 2  ;;  %s560_s5 = sand.u32 1, %s912_s15  }
 0x12b   : > { %s561_s6 = scalar_lea.sflag [#allocation3], %s560_s5 }
 0x12c   : > { %p761_p3 = pnand %p764_p2, %p1010_p8 }
 0x12e   : > { %907 = dma.done.wait (!%p761_p3), %s561_s6, 512  }
 0x12f   : > { %909 = vsyncadd (!%p761_p3), %s561_s6, 4294966784  ;;  %s17_s20 = sadd.s32 1, %s932_s20   ;;  %s1125_s15 = smov %s916_s16 }
 0x130   : > { %p14_p5 = scmp.ge.s32.totalorder %s17_s20, 4   ;;  %s1126_s16 = smov %s920_s17 }
 0x131   : > { %s1127_s17 = smov %s1016_s28  ;;  %s1128_s18 = smov %s928_s19 }
 0x132   : > { %s1129_s19 = smov %s1131_s23  ;;  %16 = sbr.rel (!%p14_p5) target bundleno = 4 (0x4), region = 80 }
 0x139   :  { %566 = vsyncpa [#allocation3], 1 }
 0x13a   :  { %568 = vsyncpa [#allocation3 + $0x1], 1 }

</bundles_post_ra>
